<compile_context>
chip_gen: v6e
topology: v6e:2x2x1
jax: 0.10.0
libtpu: 0.0.40
codegen_flags: <defaults>
</compile_context>

<pallas_src>
import functools

import numpy as np
import jax
import jax.numpy as jnp
from jax.experimental import pallas as pl
from jax.experimental.pallas import tpu as pltpu


_COPY_MIN_TAIL_BYTES = 256 * 1024   # below this the swap path builds bigger blocks
_FUSED_OK: dict = {}                # (pattern, ...) -> did the fused variant lower/verify?


@functools.lru_cache(maxsize=None)
def _hw_params():
    """(per-block VMEM budget in bytes, vmem_limit_bytes) for the local TPU."""
    phys = None
    try:
        info = pltpu.get_tpu_info()
        for name in ("vmem_capacity_bytes", "vmem_size_bytes", "vmem_bytes"):
            v = getattr(info, name, None)
            if v:
                phys = int(v)
                break
    except Exception:
        phys = None
    if phys is not None and phys >= 128 * 1024 * 1024:
        # v5e / v6e (128 MiB physical VMEM): bigger blocks + raised scoped limit.
        return 4 * 1024 * 1024, 64 * 1024 * 1024
    # v7x (64 MiB per TensorCore) or unknown generation: stay conservative.
    return 2 * 1024 * 1024, 24 * 1024 * 1024


def _sublane_unit(dtype) -> int:
    """Sublane tiling unit: 8 for 32-bit, 16 for bf16/f16, 32 for int8/fp8."""
    return max(8, 32 // max(1, np.dtype(dtype).itemsize))


def _largest_div_tile(dim: int, unit: int, cap: int):
    """Largest multiple of `unit` dividing `dim` that is <= cap (None if absent)."""
    cap = min(dim, max(cap, unit))
    t = (cap // unit) * unit
    steps = 0
    while t >= unit and steps < 4096:
        if dim % t == 0:
            return t
        t -= unit
        steps += 1
    return None


def _pick_tile(dim: int, unit: int, max_elems: int) -> int:
    """Tile along `dim`: the full dim if it fits the budget, else a multiple of
    `unit` bounded by `max_elems` (possibly ragged; pair with pl.cdiv grids)."""
    max_elems = max(int(max_elems), unit)
    if dim <= max_elems:
        return dim
    cap = (max_elems // unit) * unit
    t = _largest_div_tile(dim, unit, cap)
    if t is not None and t * 4 >= cap:      # exact divisor, not pathologically small
        return t
    return cap                              # ragged tile; grid must use pl.cdiv


def _moveaxis_perm(src: int, dest: int, ndim: int):
    src %= ndim
    dest %= ndim
    order = [i for i in range(ndim) if i != src]
    order.insert(dest, src)
    return tuple(order), src, dest


def _prod(dims) -> int:
    return int(np.prod(dims)) if len(dims) else 1


def _canonical_groups(shape, src, dest):
    """moveaxis(src, dest) == reshape to (P, A, B, S), swap A<->B, reshape back."""
    if src < dest:
        p_dims, a_dims = shape[:src], shape[src:src + 1]
        b_dims, s_dims = shape[src + 1:dest + 1], shape[dest + 1:]
    else:
        p_dims, a_dims = shape[:dest], shape[dest:src]
        b_dims, s_dims = shape[src:src + 1], shape[src + 1:]
    return _prod(p_dims), _prod(a_dims), _prod(b_dims), _prod(s_dims)


def _copy_kernel(x_ref, o_ref):
    o_ref[...] = x_ref[...]


def _try_fused(key, fused_fn, args, ref_fn):
    """Run a lane-dense fused variant; fall back (return None) if Mosaic rejects
    the in-kernel relayout.  The first call per pattern is validated numerically
    so a bad lowering degrades gracefully to the plain (proven) path."""
    state = _FUSED_OK.get(key)
    if state is False:
        return None
    try:
        out = fused_fn(*args)
        if state is None:
            ref = ref_fn()
            try:
                ok = bool(jnp.array_equal(out, ref))
            except Exception:           # abstract values under tracing: cannot check
                ok = True
            if not ok:
                raise ValueError("fused moveaxis variant mismatch")
        _FUSED_OK[key] = True
        return out
    except Exception:
        _FUSED_OK[key] = False
        return None


# ---------------------------------------------------------------------------
# Copy path: last two (or more) axes unmoved -> pure BlockSpec/DMA re-tiling.
# ---------------------------------------------------------------------------
def _movedim_copy(x, perm, m, out_shape, budget_elems, sub_unit, vmem_limit):
    lead_in, lead_out = tuple(x.shape[:m]), tuple(out_shape[:m])
    tail = _prod(x.shape[m:])
    # Fold the whole unmoved contiguous tail into ONE axis so both the load and
    # the store are lane-dense even when the original minor dim is < 128.
    x_v = x.reshape(lead_in + (tail,))
    unit = sub_unit * 128                    # full (sublanes, 128) native tiles
    t = _pick_tile(tail, unit, budget_elems)
    inv = tuple(perm.index(a) for a in range(m))

    def in_map(*idx):
        return tuple(idx[inv[a]] for a in range(m)) + (idx[m],)

    def out_map(*idx):
        return tuple(idx[:m]) + (idx[m],)

    block = (pl.Squeezed(),) * m + (t,)
    grid = lead_out + (pl.cdiv(tail, t),)
    # TODO(synk): sweep pipeline_mode=pl.Buffered(3) on in_specs for small tails.
    out_v = pl.pallas_call(
        _copy_kernel,
        out_shape=jax.ShapeDtypeStruct(lead_out + (tail,), x.dtype),
        grid=grid,
        in_specs=[pl.BlockSpec(block, in_map)],
        out_specs=pl.BlockSpec(block, out_map),
        compiler_params=pltpu.CompilerParams(
            dimension_semantics=("parallel",) * len(grid),
            vmem_limit_bytes=vmem_limit),
    )(x_v)
    return out_v.reshape(out_shape)


# ---------------------------------------------------------------------------
# Swap paths: canonical (P, A, B, S) -> (P, B, A, S).
# ---------------------------------------------------------------------------
def _movedim_s1_fused(x, P, A, B, out_shape, budget_elems, vmem_limit):
    """(P, A, B) -> (P, B, A) with A < 128, B % 128 == 0: lane-dense output.

    Output is viewed wrapper-side as (P, B*A/128, 128); the kernel transposes an
    (A, tb) tile and re-lays it out as (tb*A/128, 128), so every store is an
    unmasked full-width vst and the output DMA rows are dense.  tb must divide B
    exactly so ragged blocks never mix valid and padded lanes inside one row.
    """
    x_v = x.reshape(P, A, B)
    tb = _largest_div_tile(B, 128, max(128, budget_elems // max(A, 1)))
    if tb is None:                         # cannot happen when B % 128 == 0
        raise ValueError("no 128-aligned divisor tile")
    rows = (tb * A) // 128
    r_total = (B * A) // 128

    def kernel(x_ref, o_ref):
        # (A, tb) -> (tb, A) -> lane-dense (rows, 128) relayout.
        o_ref[...] = x_ref[...].T.reshape(o_ref.shape)

    out_v = pl.pallas_call(
        kernel,
        out_shape=jax.ShapeDtypeStruct((P, r_total, 128), x.dtype),
        grid=(P, B // tb),
        in_specs=[pl.BlockSpec((pl.Squeezed(), A, tb), lambda p, bi: (p, 0, bi))],
        out_specs=pl.BlockSpec((pl.Squeezed(), rows, 128), lambda p, bi: (p, bi, 0)),
        compiler_params=pltpu.CompilerParams(
            dimension_semantics=("parallel", "parallel"),
            vmem_limit_bytes=vmem_limit),
    )(x_v)
    return out_v.reshape(out_shape)


def _movedim_s1_plain(x, P, A, B, out_shape, budget_elems, vmem_limit):
    """Plain 2-D sublane<->lane tile transpose: (P, A, B) -> (P, B, A)."""
    x_v = x.reshape(P, A, B)
    # Bias the aspect toward a wide OUTPUT lane dim (ta is the output minor).
    ta = _pick_tile(A, 128, min(1024, budget_elems))
    tb = _pick_tile(B, 128, max(128, budget_elems // ta))

    def kernel(x_ref, o_ref):
        o_ref[...] = x_ref[...].T

    grid = (P, pl.cdiv(A, ta), pl.cdiv(B, tb))
    out_v = pl.pallas_call(
        kernel,
        out_shape=jax.ShapeDtypeStruct((P, B, A), x.dtype),
        grid=grid,
        in_specs=[pl.BlockSpec((pl.Squeezed(), ta, tb),
                               lambda p, ai, bi: (p, ai, bi))],
        out_specs=pl.BlockSpec((pl.Squeezed(), tb, ta),
                               lambda p, ai, bi: (p, bi, ai)),
        compiler_params=pltpu.CompilerParams(
            dimension_semantics=("parallel",) * 3,
            vmem_limit_bytes=vmem_limit),
    )(x_v)
    return out_v.reshape(out_shape)


def _movedim_s_fold(x, P, A, B, S, out_shape, budget_elems, sub_unit, vmem_limit):
    """(P, A, B, S) -> output folded to (P, B, A*S): lane-dense VMEM output
    buffer / dense output DMA when S < 128 and A is small (static unroll)."""
    x_v = x.reshape(P, A, B, S)
    tb = _pick_tile(B, sub_unit, max(sub_unit, budget_elems // (A * S)))

    def kernel(x_ref, o_ref):
        # TODO(synk): each store is still only S lanes wide (masked); a full
        # lane-density fix needs an in-kernel (A, S) -> A*S relayout.
        for a in range(A):
            o_ref[:, a * S:(a + 1) * S] = x_ref[a]

    out_v = pl.pallas_call(
        kernel,
        out_shape=jax.ShapeDtypeStruct((P, B, A * S), x.dtype),
        grid=(P, pl.cdiv(B, tb)),
        in_specs=[pl.BlockSpec((pl.Squeezed(), A, tb, S),
                               lambda p, bi: (p, 0, bi, 0))],
        out_specs=pl.BlockSpec((pl.Squeezed(), tb, A * S),
                               lambda p, bi: (p, bi, 0)),
        compiler_params=pltpu.CompilerParams(
            dimension_semantics=("parallel", "parallel"),
            vmem_limit_bytes=vmem_limit),
    )(x_v)
    return out_v.reshape(out_shape)


def _movedim_s3_plain(x, P, A, B, S, out_shape, budget_elems, sub_unit, vmem_limit):
    """General (P, A, B, S) -> (P, B, A, S): swap the two leading block axes,
    minor (lane) axis untouched (no lane relayout)."""
    x_v = x.reshape(P, A, B, S)
    ts = _pick_tile(S, 128, max(128, budget_elems // (2 * sub_unit * sub_unit)))
    rem = max(2 * sub_unit * sub_unit, budget_elems // ts)
    ta = _pick_tile(A, sub_unit, min(256, rem // sub_unit))
    tb = _pick_tile(B, sub_unit, rem // ta)

    def kernel(x_ref, o_ref):
        o_ref[...] = jnp.swapaxes(x_ref[...], 0, 1)

    grid = (P, pl.cdiv(A, ta), pl.cdiv(B, tb), pl.cdiv(S, ts))
    out_v = pl.pallas_call(
        kernel,
        out_shape=jax.ShapeDtypeStruct((P, B, A, S), x.dtype),
        grid=grid,
        in_specs=[pl.BlockSpec((pl.Squeezed(), ta, tb, ts),
                               lambda p, ai, bi, si: (p, ai, bi, si))],
        out_specs=pl.BlockSpec((pl.Squeezed(), tb, ta, ts),
                               lambda p, ai, bi, si: (p, bi, ai, si)),
        compiler_params=pltpu.CompilerParams(
            dimension_semantics=("parallel",) * 4,
            vmem_limit_bytes=vmem_limit),
    )(x_v)
    return out_v.reshape(out_shape)


def _movedim_swap(x, P, A, B, S, out_shape, budget_elems, sub_unit, vmem_limit):
    dtype_name = np.dtype(x.dtype).name

    def _swap_ref():
        return jnp.transpose(x.reshape(P, A, B, S), (0, 2, 1, 3)).reshape(out_shape)

    if S == 1:
        if A < 128 and B % 128 == 0:
            out = _try_fused(("s1_fused", int(A), dtype_name),
                             _movedim_s1_fused,
                             (x, P, A, B, out_shape, budget_elems, vmem_limit),
                             _swap_ref)
            if out is not None:
                return out
        return _movedim_s1_plain(x, P, A, B, out_shape, budget_elems, vmem_limit)

    if 1 < S < 128 and A <= 64 and A * S * sub_unit <= budget_elems:
        out = _try_fused(("s_fold", int(A), int(S), dtype_name),
                         _movedim_s_fold,
                         (x, P, A, B, S, out_shape, budget_elems, sub_unit, vmem_limit),
                         _swap_ref)
        if out is not None:
            return out
    return _movedim_s3_plain(x, P, A, B, S, out_shape, budget_elems, sub_unit, vmem_limit)


def movedim_pallas(x: jax.Array, src: int, dest: int) -> jax.Array:
    """Pallas equivalent of torch.Tensor.moveaxis(src, dest)."""
    ndim = x.ndim
    if ndim == 0:
        return x
    perm, src_n, dest_n = _moveaxis_perm(src, dest, ndim)
    if src_n == dest_n:
        return x                                   # identity: zero data movement
    out_shape = tuple(x.shape[p] for p in perm)
    if x.size == 0:
        return x.reshape(out_shape)                # degenerate empty tensor

    P, A, B, S = _canonical_groups(x.shape, src_n, dest_n)
    if A == 1 or B == 1:
        return x.reshape(out_shape)                # moved group has size 1: free reshape

    block_budget, vmem_limit = _hw_params()
    itemsize = np.dtype(x.dtype).itemsize
    budget_elems = max(1024, block_budget // itemsize)
    sub_unit = _sublane_unit(x.dtype)

    # Copy path only when the unmoved tail is big enough that pure DMA re-tiling
    # beats the swap path (which can also build blocks out of A/B tiles).
    suffix_len = ndim - 1 - max(src_n, dest_n)
    if suffix_len >= 2 and S * itemsize >= _COPY_MIN_TAIL_BYTES:
        return _movedim_copy(x, perm, ndim - suffix_len, out_shape,
                             budget_elems, sub_unit, vmem_limit)
    return _movedim_swap(x, P, A, B, S, out_shape, budget_elems, sub_unit, vmem_limit)


class MoveDim:
    """Mirrors the PyTorch MoveDim module (no parameters)."""

    def __init__(self, src: int, dest: int) -> None:
        self.src = src
        self.dest = dest

    def __call__(self, x: jax.Array) -> jax.Array:
        return movedim_pallas(x, self.src, self.dest)


if __name__ == "__main__":
    key = jax.random.PRNGKey(0)
    # Small NCHW input: batch=2, channels=4, spatial=16x16.
    x = jax.random.normal(key, (2, 4, 16, 16), dtype=jnp.float32)

    def check(arr, src, dest):
        y = jax.block_until_ready(movedim_pallas(arr, src, dest))
        ref = jnp.moveaxis(arr, src, dest)
        assert y.shape == ref.shape, (src, dest, y.shape, ref.shape)
        assert y.dtype == ref.dtype, (src, dest, y.dtype, ref.dtype)
        np.testing.assert_array_equal(np.asarray(y), np.asarray(ref))

    # Paths exercised: lane-dense fused transpose (NCHW->NHWC), folded S<128
    # swap, generic 3-D swap, identity, plain 2-D transpose (A >= 128).
    for src, dest in [(1, -1), (0, 2), (1, 0), (2, 2), (3, 0)]:
        check(x, src, dest)

    # bf16 exercises the dtype-aware sublane tiling units.
    check(x.astype(jnp.bfloat16), 1, -1)

    # Larger unmoved contiguous tail -> pure-DMA copy/re-tiling path.
    x_big = jax.random.normal(jax.random.PRNGKey(0), (2, 2, 384, 192),
                              dtype=jnp.float32)
    check(x_big, 0, 1)

    # Module form, as used in the weather-model pipeline (NCHW -> NHWC).
    model = MoveDim(1, -1)
    y = jax.block_until_ready(model(x))
    np.testing.assert_array_equal(np.asarray(y), np.asarray(jnp.moveaxis(x, 1, -1)))

    print("KERNEL_OK")
</pallas_src>

<mosaic_0001>
module attributes {stable_mosaic.version = 11 : i64} {
  func.func @kernel(%arg0: i32, %arg1: i32, %arg2: memref<1x4x256xf32, #tpu.memory_space<vmem>>, %arg3: memref<1x8x128xf32, #tpu.memory_space<vmem>>) attributes {dimension_semantics = [#tpu.dimension_semantics<parallel>, #tpu.dimension_semantics<parallel>], iteration_bounds = array<i64: 2, 1>, scalar_prefetch = 0 : i64, scratch_operands = 0 : i64, tpu.core_type = #tpu.core_type<tc>, window_params = [{transform_indices = @transform_0, window_bounds = array<i64: 1, 4, 256>}, {transform_indices = @transform_1, window_bounds = array<i64: 1, 8, 128>}]} {
    %c0 = arith.constant 0 : index
    %c0_0 = arith.constant 0 : index
    %c0_1 = arith.constant 0 : index
    %0 = vector.load %arg2[%c0, %c0_0, %c0_1] : memref<1x4x256xf32, #tpu.memory_space<vmem>>, vector<1x4x256xf32>
    %1 = vector.shape_cast %0 : vector<1x4x256xf32> to vector<4x256xf32>
    %2 = tpu.transpose %1, [1, 0] : vector<4x256xf32> -> vector<256x4xf32>
    %3 = vector.shape_cast %2 : vector<256x4xf32> to vector<8x128xf32>
    %c0_2 = arith.constant 0 : index
    %c0_3 = arith.constant 0 : index
    %c0_4 = arith.constant 0 : index
    %4 = vector.load %arg3[%c0_2, %c0_3, %c0_4] : memref<1x8x128xf32, #tpu.memory_space<vmem>>, vector<1x8x128xf32>
    %5 = vector.shape_cast %4 : vector<1x8x128xf32> to vector<8x128xf32>
    %6 = vector.shape_cast %3 : vector<8x128xf32> to vector<1x8x128xf32>
    tpu.vector_store %arg3[%c0_2, %c0_3, %c0_4], %6 {strides = array<i32>} : memref<1x8x128xf32, #tpu.memory_space<vmem>>, vector<1x8x128xf32>,
    return
  }
  func.func @transform_0(%arg0: i32, %arg1: i32) -> (i32, i32, i32) {
    %c0_i32 = arith.constant 0 : i32
    %c0_i32_0 = arith.constant 0 : i32
    return %arg0, %c0_i32, %arg1 : i32, i32, i32
  }
  func.func @transform_1(%arg0: i32, %arg1: i32) -> (i32, i32, i32) {
    %c0_i32 = arith.constant 0 : i32
    %c0_i32_0 = arith.constant 0 : i32
    return %arg0, %arg1, %c0_i32 : i32, i32, i32
  }
}

module attributes {stable_mosaic.version = 11 : i64} {
  func.func @kernel(%arg0: i32, %arg1: i32, %arg2: i32, %arg3: memref<1x4x256xf32, #tpu.memory_space<vmem>>, %arg4: memref<1x256x4xf32, #tpu.memory_space<vmem>>) attributes {dimension_semantics = [#tpu.dimension_semantics<parallel>, #tpu.dimension_semantics<parallel>, #tpu.dimension_semantics<parallel>], iteration_bounds = array<i64: 2, 1, 1>, scalar_prefetch = 0 : i64, scratch_operands = 0 : i64, tpu.core_type = #tpu.core_type<tc>, window_params = [{transform_indices = @transform_0, window_bounds = array<i64: 1, 4, 256>}, {transform_indices = @transform_1, window_bounds = array<i64: 1, 256, 4>}]} {
    %c0 = arith.constant 0 : index
    %c0_0 = arith.constant 0 : index
    %c0_1 = arith.constant 0 : index
    %0 = vector.load %arg3[%c0, %c0_0, %c0_1] : memref<1x4x256xf32, #tpu.memory_space<vmem>>, vector<1x4x256xf32>
    %1 = vector.shape_cast %0 : vector<1x4x256xf32> to vector<4x256xf32>
    %2 = tpu.transpose %1, [1, 0] : vector<4x256xf32> -> vector<256x4xf32>
    %c0_2 = arith.constant 0 : index
    %c0_3 = arith.constant 0 : index
    %c0_4 = arith.constant 0 : index
    %3 = vector.load %arg4[%c0_2, %c0_3, %c0_4] : memref<1x256x4xf32, #tpu.memory_space<vmem>>, vector<1x256x4xf32>
    %4 = vector.shape_cast %3 : vector<1x256x4xf32> to vector<256x4xf32>
    %5 = vector.shape_cast %2 : vector<256x4xf32> to vector<1x256x4xf32>
    tpu.vector_store %arg4[%c0_2, %c0_3, %c0_4], %5 {strides = array<i32>} : memref<1x256x4xf32, #tpu.memory_space<vmem>>, vector<1x256x4xf32>,
    return
  }
  func.func @transform_0(%arg0: i32, %arg1: i32, %arg2: i32) -> (i32, i32, i32) {
    %c0_i32 = arith.constant 0 : i32
    return %arg0, %arg1, %arg2 : i32, i32, i32
  }
  func.func @transform_1(%arg0: i32, %arg1: i32, %arg2: i32) -> (i32, i32, i32) {
    %c0_i32 = arith.constant 0 : i32
    return %arg0, %arg2, %arg1 : i32, i32, i32
  }
}

</mosaic_0001>

<bundles_post_ra>
// kernel: tpu_custom_call.1
= control target key start
LH: loop header
LB: loop body
LE: loop exit
PB: predicated region body
PF: predicated region fallthrough
CT: control target
= control target key end

     0   :  { %6 = vsyncpa [#allocation3], 0  ;;  %s722_s0 = inlined_call_operand.hbm [shape: f32[2,4,256], index: 0, kind: input, shape index: {}]   ;;  %s723_s1 = inlined_call_operand.vmem [shape: f32[2,256,4], index: 1, kind: output, shape index: {}]  }
   0x1   :  { %8 = vsyncpa [#allocation3 + $0x1], 0  ;;  %s556_s6 = smov 0   ;;  %s558_s7 = smov 0  }
   0x2   :  { %s560_s8 = smov 0   ;;  %s562_s9 = smov 0  }
   0x3   :  { %s564_s10 = smov 0   ;;  %s566_s11 = smov 0  }
   0x4 LB: > { %s393_s12 = sadd.s32 4294967295, %s543_s11   ;;  %s33_s13 = sadd.s32 1, %s539_s10  ;;  %s543_s11 = sphi %s566_s11, %s14_s11   ;;  %s539_s10 = sphi %s564_s10, %s731_s10   ;;  %s535_s9 = sphi %s562_s9, %s730_s9   ;;  %s531_s8 = sphi %s560_s8, %s729_s8   ;;  %s527_s7 = sphi %s558_s7, %s728_s7   ;;  %s523_s6 = sphi %s556_s6, %s727_s6  }
   0x5   : > { %p35_p0 = scmp.ge.s32.totalorder %s33_s13, 2  ;;  %s44_s14 = sadd.s32 1, %s531_s8 }
   0x6   : > { %p51_p1 = scmp.ne.s32.totalorder %s531_s8, %s527_s7  ;;  %p52_p2 = scmp.eq.s32.totalorder %s543_s11, 0 }
   0x7   : > { %s733_s13 = smov (%p35_p0, %s33_s13), 0  ;;  %p57_p4 = scmp.ne.s32.totalorder %s527_s7, %s523_s6 }
   0x8   : > { %p592_p3 = por %p52_p2, %p51_p1  ;;  %s37_s16 = ssub.s32 %s539_s10, %s733_s13 }
   0x9   : > { %p58_p5 = scmp.eq.s32.totalorder %s393_s12, 0  ;;  %p42_p6 = scmp.eq.s32.totalorder %s37_s16, 0 }
   0xa   : > { %p414_p8 = scmp.lt.s32.totalorder %s543_s11, 2  ;;  %s111_s19 = sand.u32 1, %s531_s8  }
   0xb   : > { %p599_p7 = por %p58_p5, %p57_p4  ;;  %s406_s20 = sshll.u32 %s539_s10, 7 }
   0xc   : > { %s605_s18 = scalar_select %p42_p6, %s531_s8, %s44_s14  }
   0xd   : > { %s397_s21 = sshll.u32 %s111_s19, 3  ;;  %s125_s24 = scalar_lea.hbm %s722_s0, %s406_s20 }
   0xe   : > { %s115_s25 = scalar_lea.vmem [#allocation2], %s397_s21  ;;  %p614_p9 = pnand %p414_p8, %p592_p3 }
   0xf   : > { %s127_s26 = sshll.u32 %s115_s25, 4  ;;  %p400_p10 = scmp.ge.s32.totalorder %s543_s11, 1  ;;  %s128_s26 = int_to_ptr.vmem [resolvable:$true] %s127_s26 }
  0x10   : > { %p132_p11 = scmp.lt.s32.totalorder %s543_s11, 3  ;;  %s112_s28 = scalar_lea.sflag [#allocation3], %s111_s19 }
  0x11   : > { %p467_p12 = pneg %p614_p9  ;;  %s478_s29 = scalar_lea.vmem %s128_s26, 128 }
  0x12   : > { %p479_p13 = scmp.ne.s32.totalorder %s128_s26, %s478_s29  ;;  %s545_s30 = smov [#allocation2]  }
  0x13   : > { %s483_s2 = sshll.u32 %s545_s30, 4  ;;  %s484_s2 = int_to_ptr.vmem [resolvable:$false] %s483_s2 }
  0x14   : > { %p481_p0 = pnand %p479_p13, %p467_p12  ;;  %s485_s3 = scalar_lea.vmem %s484_s2, 256 }
  0x15   : > { %p486_p2 = scmp.lt.s32.totalorder %s128_s26, %s484_s2  ;;  %p487_p3 = scmp.lt.s32.totalorder %s485_s3, %s478_s29 }
  0x16   : > { %p482_p1 = pneg %p481_p0 }
  0x17   : > { %p488_p4 = por %p487_p3, %p486_p2 }
  0x19   : > { %p489_p5 = pnand %p488_p4, %p482_p1 }
  0x1b   : > { %492 = shalt.err (!%p489_p5)
}
  0x1c   : > { %413 = dma.hbm_to_vmem [thread:$0]  (!%p614_p9), %s125_s24, 128, %s128_s26, %s112_s28  }
  0x1d   : > { %p133_p6 = pnand %p400_p10, %p132_p11 }
  0x1e   : > { %s138_s4 = sand.u32 (!%p133_p6), 1, %s527_s7  }
  0x1f   : > { %136 = sbr.rel (%p133_p6) target bundleno = 288 (0x120), region = 24  ;;  %s401_s5 = sshll.u32 (!%p133_p6), %s138_s4, 3 }
  0x20   : > { %s139_s6 = scalar_lea.sflag (!%p133_p6), [#allocation3], %s138_s4  ;;  %s142_s12 = scalar_lea.vmem (!%p133_p6), [#allocation2], %s401_s5 }
  0x24   : > { %518 = dma.done.wait (%p599_p7), %s139_s6, 128  }
  0x25   : > { %520 = vsyncadd (%p599_p7), %s139_s6, 4294967168  ;;  %v182_v0 = vld [vmem:[%s142_s12] sm:$0xff]  ;;  %p170_p8 = scmp.lt.s32.totalorder %s535_s9, 1  ;;  %vm250_vm0 = vcmask 31744  }
  0x26   : > { %186 = vxpose.xlu0.b32.start.end [1/1] (short) %v182_v0, 128  ;;  %v184_v1 = vcombine.high %v182_v0, %v182_v0 }
  0x27   : > { %s735_s9 = smov (!%p170_p8, %s535_s9), 1 }
  0x28   : > { %s407_s14 = sshll.u32 %s735_s9, 8 }
  0x29   : > { %s638_s19 = scalar_lea.vmem %s723_s1, %s407_s14 }
  0x63   : > { %218 = vxpose.xlu0.b32.start.end [1/1] (short) %v184_v1, 128 }
  0xa2   : > { %v202_v2 = vpop.trf.xlu0 }
  0xa3   : > { %251 = vst.msk [vmem:[%s638_s19] sm:$0xff] %vm250_vm0, %v202_v2 }
  0xa6   : > { %v203_v3 = vpop.trf.xlu0 }
  0xa7   : > { %252 = vst.msk [vmem:[%s638_s19 + $0x8] sm:$0xff] %vm250_vm0, %v203_v3 }
  0xaa   : > { %v204_v4 = vpop.trf.xlu0 }
  0xab   : > { %253 = vst.msk [vmem:[%s638_s19 + $0x10] sm:$0xff] %vm250_vm0, %v204_v4 }
  0xae   : > { %v205_v5 = vpop.trf.xlu0 }
  0xaf   : > { %254 = vst.msk [vmem:[%s638_s19 + $0x18] sm:$0xff] %vm250_vm0, %v205_v5 }
  0xb2   : > { %v206_v6 = vpop.trf.xlu0 }
  0xb3   : > { %255 = vst.msk [vmem:[%s638_s19 + $0x20] sm:$0xff] %vm250_vm0, %v206_v6 }
  0xb6   : > { %v207_v7 = vpop.trf.xlu0 }
  0xb7   : > { %256 = vst.msk [vmem:[%s638_s19 + $0x28] sm:$0xff] %vm250_vm0, %v207_v7 }
  0xba   : > { %v208_v8 = vpop.trf.xlu0 }
  0xbb   : > { %257 = vst.msk [vmem:[%s638_s19 + $0x30] sm:$0xff] %vm250_vm0, %v208_v8 }
  0xbe   : > { %v209_v9 = vpop.trf.xlu0 }
  0xbf   : > { %258 = vst.msk [vmem:[%s638_s19 + $0x38] sm:$0xff] %vm250_vm0, %v209_v9 }
  0xc2   : > { %v210_v10 = vpop.trf.xlu0 }
  0xc3   : > { %259 = vst.msk [vmem:[%s638_s19 + $0x40] sm:$0xff] %vm250_vm0, %v210_v10 }
  0xc6   : > { %v211_v11 = vpop.trf.xlu0 }
  0xc7   : > { %260 = vst.msk [vmem:[%s638_s19 + $0x48] sm:$0xff] %vm250_vm0, %v211_v11 }
  0xca   : > { %v212_v12 = vpop.trf.xlu0 }
  0xcb   : > { %261 = vst.msk [vmem:[%s638_s19 + $0x50] sm:$0xff] %vm250_vm0, %v212_v12 }
  0xce   : > { %v213_v13 = vpop.trf.xlu0 }
  0xcf   : > { %262 = vst.msk [vmem:[%s638_s19 + $0x58] sm:$0xff] %vm250_vm0, %v213_v13 }
  0xd2   : > { %v214_v14 = vpop.trf.xlu0 }
  0xd3   : > { %263 = vst.msk [vmem:[%s638_s19 + $0x60] sm:$0xff] %vm250_vm0, %v214_v14 }
  0xd6   : > { %v215_v15 = vpop.trf.xlu0 }
  0xd7   : > { %264 = vst.msk [vmem:[%s638_s19 + $0x68] sm:$0xff] %vm250_vm0, %v215_v15 }
  0xda   : > { %v216_v16 = vpop.trf.xlu0 }
  0xdb   : > { %265 = vst.msk [vmem:[%s638_s19 + $0x70] sm:$0xff] %vm250_vm0, %v216_v16 }
  0xde   : > { %v217_v17 = vpop.trf.xlu0 }
  0xdf   : > { %266 = vst.msk [vmem:[%s638_s19 + $0x78] sm:$0xff] %vm250_vm0, %v217_v17 }
  0xe2   : > { %v234_v18 = vpop.trf.xlu0 }
  0xe3   : > { %267 = vst.msk [vmem:[%s638_s19 + $0x80] sm:$0xff] %vm250_vm0, %v234_v18 }
  0xe6   : > { %v235_v19 = vpop.trf.xlu0 }
  0xe7   : > { %268 = vst.msk [vmem:[%s638_s19 + $0x88] sm:$0xff] %vm250_vm0, %v235_v19 }
  0xea   : > { %v236_v20 = vpop.trf.xlu0 }
  0xeb   : > { %269 = vst.msk [vmem:[%s638_s19 + $0x90] sm:$0xff] %vm250_vm0, %v236_v20 }
  0xee   : > { %v237_v21 = vpop.trf.xlu0 }
  0xef   : > { %270 = vst.msk [vmem:[%s638_s19 + $0x98] sm:$0xff] %vm250_vm0, %v237_v21 }
  0xf2   : > { %v238_v22 = vpop.trf.xlu0 }
  0xf3   : > { %271 = vst.msk [vmem:[%s638_s19 + $0xa0] sm:$0xff] %vm250_vm0, %v238_v22 }
  0xf6   : > { %v239_v23 = vpop.trf.xlu0 }
  0xf7   : > { %272 = vst.msk [vmem:[%s638_s19 + $0xa8] sm:$0xff] %vm250_vm0, %v239_v23 }
  0xfa   : > { %v240_v24 = vpop.trf.xlu0 }
  0xfb   : > { %273 = vst.msk [vmem:[%s638_s19 + $0xb0] sm:$0xff] %vm250_vm0, %v240_v24 }
  0xfe   : > { %v241_v25 = vpop.trf.xlu0 }
  0xff   : > { %274 = vst.msk [vmem:[%s638_s19 + $0xb8] sm:$0xff] %vm250_vm0, %v241_v25 }
 0x102   : > { %v242_v26 = vpop.trf.xlu0 }
 0x103   : > { %275 = vst.msk [vmem:[%s638_s19 + $0xc0] sm:$0xff] %vm250_vm0, %v242_v26 }
 0x106   : > { %v243_v27 = vpop.trf.xlu0 }
 0x107   : > { %276 = vst.msk [vmem:[%s638_s19 + $0xc8] sm:$0xff] %vm250_vm0, %v243_v27 }
 0x10a   : > { %v244_v28 = vpop.trf.xlu0 }
 0x10b   : > { %277 = vst.msk [vmem:[%s638_s19 + $0xd0] sm:$0xff] %vm250_vm0, %v244_v28 }
 0x10e   : > { %v245_v29 = vpop.trf.xlu0 }
 0x10f   : > { %278 = vst.msk [vmem:[%s638_s19 + $0xd8] sm:$0xff] %vm250_vm0, %v245_v29 }
 0x112   : > { %v246_v30 = vpop.trf.xlu0 }
 0x113   : > { %279 = vst.msk [vmem:[%s638_s19 + $0xe0] sm:$0xff] %vm250_vm0, %v246_v30 }
 0x116   : > { %v247_v31 = vpop.trf.xlu0 }
 0x117   : > { %280 = vst.msk [vmem:[%s638_s19 + $0xe8] sm:$0xff] %vm250_vm0, %v247_v31 }
 0x11a   : > { %v248_v32 = vpop.trf.xlu0 }
 0x11b   : > { %281 = vst.msk [vmem:[%s638_s19 + $0xf0] sm:$0xff] %vm250_vm0, %v248_v32 }
 0x11e   : > { %v249_v33 = vpop.trf.xlu0 }
 0x11f   : > { %282 = vst.msk [vmem:[%s638_s19 + $0xf8] sm:$0xff] %vm250_vm0, %v249_v33 }
 0x120 PF: > { %s14_s11 = sadd.s32 1, %s543_s11   ;;  %s727_s6 = smov %s527_s7 }
 0x121   : > { %p11_p7 = scmp.ge.s32.totalorder %s14_s11, 4   ;;  %s728_s7 = smov %s531_s8 }
 0x122   : > { %s729_s8 = smov %s605_s18  ;;  %s730_s9 = smov %s539_s10 }
 0x123   : > { %s731_s10 = smov %s733_s13  ;;  %13 = sbr.rel (!%p11_p7) target bundleno = 4 (0x4), region = 64 }
 0x128   :  { %319 = vsyncpa [#allocation3], 1 }
 0x129   :  { %321 = vsyncpa [#allocation3 + $0x1], 1 }

</bundles_post_ra>
